<compile_context>
chip_gen: v7x
topology: tpu7x:2x2x1
jax: 0.10.0
libtpu: 0.0.40
codegen_flags: <defaults>
</compile_context>

<pallas_src>
import functools

import jax
import jax.numpy as jnp
from jax.experimental import pallas as pl
from jax.experimental.pallas import tpu as pltpu

NUM_CLASSES = 10


def _ls_ce_kernel(x_ref, out_ref, *, smoothing, num_classes):
    """x_ref: (B, C, N) logits in VMEM (full-array block; class axis on sublanes, N on lanes).

    out_ref: (1, 1) f32 in SMEM (scalar loss).
    """
    C = num_classes
    x = x_ref[...].astype(jnp.float32)                                     # cast on load (bf16 ok)

    # Class-axis (axis=1) log-softmax statistics == log_softmax over the last axis of the
    # permuted (B, N, C) tensor in the reference.  Cheap sublane reductions per (C, N) slab.
    col_max = jnp.max(x, axis=1, keepdims=True)                            # (B, 1, N)
    lse = jnp.log(jnp.sum(jnp.exp(x - col_max), axis=1, keepdims=True))    # (B, 1, N)
    col_mean = jnp.mean(x, axis=1, keepdims=True)                          # (B, 1, N)

    # smooth[b, n] = -mean_c logprobs[b, n, c] = col_max + lse - col_mean  (no full lsm needed)
    smooth = col_max + lse - col_mean                                      # (B, 1, N)

    # Reference gather:  nll[b, j] = -logprobs[b, 0, oh[b, j]],  oh[b, j] in {0, 1} with exactly
    # one 1 per row for any valid target, so only classes 0 and 1 at column n == 0 are reachable:
    #   sum_j nll[b, j] = -(logprobs[b, 0, 1] + (C - 1) * logprobs[b, 0, 0]).
    lp0 = x[:, 0:1, 0:1] - col_max[:, :, 0:1] - lse[:, :, 0:1]             # (B, 1, 1)
    lp1 = x[:, 1:2, 0:1] - col_max[:, :, 0:1] - lse[:, :, 0:1]             # (B, 1, 1)
    sum_nll = jnp.sum(-(lp1 + (float(C) - 1.0) * lp0))
    sum_smooth = jnp.sum(smooth)

    confidence = 1.0 - smoothing
    denom = float(x.shape[0] * C)                                          # B * 10 loss elements
    out_ref[0, 0] = (confidence * sum_nll + smoothing * sum_smooth) / denom


def label_smoothing_cross_entropy(x, target, smoothing=0.1):
    B, C, N = x.shape
    if C != NUM_CLASSES or N != NUM_CLASSES:
        # The reference's (B,10) + (B,N) broadcast and the fixed F.one_hot(..., 10) force this.
        raise ValueError(f"expected x of shape (B, {NUM_CLASSES}, {NUM_CLASSES}), got {x.shape}")

    # For any in-range target, F.one_hot(target, 10) has exactly one 1 per row, so the reference's
    # one-hot-as-gather-index quirk makes the loss independent of `target`; it is accepted for API
    # parity only and never DMA'd.
    # TODO(synk): PyTorch F.one_hot raises on out-of-range targets; that error path is not mirrored.
    del target

    kernel = functools.partial(
        _ls_ce_kernel,
        smoothing=float(smoothing),
        num_classes=C,
    )
    out = pl.pallas_call(
        kernel,
        out_shape=jax.ShapeDtypeStruct((1, 1), jnp.float32),
        in_specs=[pl.BlockSpec(memory_space=pltpu.MemorySpace.VMEM)],
        out_specs=pl.BlockSpec(memory_space=pltpu.MemorySpace.SMEM),
    )(x)
    return out[0, 0]


def _reference(x, target, smoothing=0.1):
    """Pure-JAX literal mirror of the PyTorch module (one-hot values used as gather indices)."""
    lsm = jax.nn.log_softmax(jnp.transpose(x, (0, 2, 1)).astype(jnp.float32), axis=-1)  # (B, N, C)
    onehot = jax.nn.one_hot(target, NUM_CLASSES, dtype=jnp.int32)                        # (B, 10)
    # torch.gather(dim=-1, index=onehot[:, None, :]) -> result[b, 0, j] = lsm[b, 0, onehot[b, j]]
    nll = -jnp.take_along_axis(lsm[:, 0:1, :], onehot[:, None, :], axis=-1)[:, 0, :]     # (B, 10)
    smooth = -jnp.mean(lsm, axis=-1)                                                     # (B, N)
    conf = 1.0 - smoothing
    return jnp.mean(conf * nll + smoothing * smooth)


if __name__ == "__main__":
    key = jax.random.PRNGKey(0)
    kx, kt = jax.random.split(key)

    B = 2
    x = jax.random.normal(kx, (B, NUM_CLASSES, NUM_CLASSES), dtype=jnp.float32)
    target = jax.random.randint(kt, (B,), 0, NUM_CLASSES, dtype=jnp.int32)

    # f32 input
    loss = label_smoothing_cross_entropy(x, target, smoothing=0.1)
    jax.block_until_ready(loss)
    ref = _reference(x, target, smoothing=0.1)
    assert jnp.allclose(loss, ref, atol=1e-5, rtol=1e-5), (loss, ref)

    # bf16 input (exercises the DMA-narrow / cast-on-load path; math stays f32 on both sides)
    x_bf16 = x.astype(jnp.bfloat16)
    loss_bf16 = label_smoothing_cross_entropy(x_bf16, target, smoothing=0.1)
    jax.block_until_ready(loss_bf16)
    ref_bf16 = _reference(x_bf16, target, smoothing=0.1)
    assert jnp.allclose(loss_bf16, ref_bf16, atol=1e-4, rtol=1e-4), (loss_bf16, ref_bf16)

    print("KERNEL_OK")
</pallas_src>

<mosaic_0001>
module attributes {stable_mosaic.version = 11 : i64} {
  func.func @_ls_ce_kernel(%arg0: memref<2x10x10xf32, #tpu.memory_space<vmem>>, %arg1: memref<1x1xf32, #tpu.memory_space<smem>>) attributes {dimension_semantics = [], scalar_prefetch = 0 : i64, scratch_operands = 0 : i64, tpu.core_type = #tpu.core_type<tc>} {
    %c0 = arith.constant 0 : index
    %c0_0 = arith.constant 0 : index
    %c0_1 = arith.constant 0 : index
    %0 = vector.load %arg0[%c0, %c0_0, %c0_1] : memref<2x10x10xf32, #tpu.memory_space<vmem>>, vector<2x10x10xf32>
    %cst = arith.constant dense<0xFF800000> : vector<2x10xf32>
    %1 = vector.multi_reduction <maximumf>, %0, %cst [1] : vector<2x10x10xf32> to vector<2x10xf32>
    %2 = vector.shape_cast %1 : vector<2x10xf32> to vector<2x1x10xf32>
    %3 = vector.broadcast %2 : vector<2x1x10xf32> to vector<2x10x10xf32>
    %4 = arith.subf %0, %3 : vector<2x10x10xf32>
    %5 = math.exp %4 : vector<2x10x10xf32>
    %cst_2 = arith.constant dense<0.000000e+00> : vector<2x10xf32>
    %6 = vector.multi_reduction <add>, %5, %cst_2 [1] : vector<2x10x10xf32> to vector<2x10xf32>
    %7 = vector.shape_cast %6 : vector<2x10xf32> to vector<2x1x10xf32>
    %8 = math.log %7 : vector<2x1x10xf32>
    %cst_3 = arith.constant dense<0.000000e+00> : vector<2x10xf32>
    %9 = vector.multi_reduction <add>, %0, %cst_3 [1] : vector<2x10x10xf32> to vector<2x10xf32>
    %10 = vector.shape_cast %9 : vector<2x10xf32> to vector<2x1x10xf32>
    %cst_4 = arith.constant 1.000000e+01 : f32
    %11 = vector.broadcast %cst_4 : f32 to vector<2x1x10xf32>
    %12 = arith.divf %10, %11 : vector<2x1x10xf32>
    %13 = arith.addf %2, %8 : vector<2x1x10xf32>
    %14 = arith.subf %13, %12 : vector<2x1x10xf32>
    %15 = vector.extract_strided_slice %0 {offsets = [0, 0, 0], sizes = [2, 1, 1], strides = [1, 1, 1]} : vector<2x10x10xf32> to vector<2x1x1xf32>
    %16 = vector.extract_strided_slice %2 {offsets = [0, 0, 0], sizes = [2, 1, 1], strides = [1, 1, 1]} : vector<2x1x10xf32> to vector<2x1x1xf32>
    %17 = arith.subf %15, %16 : vector<2x1x1xf32>
    %18 = vector.extract_strided_slice %8 {offsets = [0, 0, 0], sizes = [2, 1, 1], strides = [1, 1, 1]} : vector<2x1x10xf32> to vector<2x1x1xf32>
    %19 = arith.subf %17, %18 : vector<2x1x1xf32>
    %20 = vector.extract_strided_slice %0 {offsets = [0, 1, 0], sizes = [2, 1, 1], strides = [1, 1, 1]} : vector<2x10x10xf32> to vector<2x1x1xf32>
    %21 = vector.extract_strided_slice %2 {offsets = [0, 0, 0], sizes = [2, 1, 1], strides = [1, 1, 1]} : vector<2x1x10xf32> to vector<2x1x1xf32>
    %22 = arith.subf %20, %21 : vector<2x1x1xf32>
    %23 = vector.extract_strided_slice %8 {offsets = [0, 0, 0], sizes = [2, 1, 1], strides = [1, 1, 1]} : vector<2x1x10xf32> to vector<2x1x1xf32>
    %24 = arith.subf %22, %23 : vector<2x1x1xf32>
    %cst_5 = arith.constant 9.000000e+00 : f32
    %25 = vector.broadcast %cst_5 : f32 to vector<2x1x1xf32>
    %26 = arith.mulf %25, %19 : vector<2x1x1xf32>
    %27 = arith.addf %24, %26 : vector<2x1x1xf32>
    %cst_6 = arith.constant 0.000000e+00 : f32
    %28 = vector.broadcast %cst_6 : f32 to vector<2x1x1xf32>
    %29 = arith.subf %28, %27 : vector<2x1x1xf32>
    %30 = vector.shape_cast %29 : vector<2x1x1xf32> to vector<1x2x1x1xf32>
    %cst_7 = arith.constant dense<0.000000e+00> : vector<1xf32>
    %31 = vector.multi_reduction <add>, %30, %cst_7 [1, 2, 3] : vector<1x2x1x1xf32> to vector<1xf32>
    %32 = vector.shape_cast %31 : vector<1xf32> to vector<1x1x1x1xf32>
    %33 = vector.extract %32[0, 0, 0, 0] : f32 from vector<1x1x1x1xf32>
    %34 = vector.shape_cast %14 : vector<2x1x10xf32> to vector<1x2x1x10xf32>
    %cst_8 = arith.constant dense<0.000000e+00> : vector<1xf32>
    %35 = vector.multi_reduction <add>, %34, %cst_8 [1, 2, 3] : vector<1x2x1x10xf32> to vector<1xf32>
    %36 = vector.shape_cast %35 : vector<1xf32> to vector<1x1x1x1xf32>
    %37 = vector.extract %36[0, 0, 0, 0] : f32 from vector<1x1x1x1xf32>
    %cst_9 = arith.constant 0.899999976 : f32
    %38 = arith.mulf %cst_9, %33 : f32
    %cst_10 = arith.constant 1.000000e-01 : f32
    %39 = arith.mulf %cst_10, %37 : f32
    %40 = arith.addf %38, %39 : f32
    %cst_11 = arith.constant 2.000000e+01 : f32
    %41 = arith.divf %40, %cst_11 : f32
    %c0_12 = arith.constant 0 : index
    %c0_13 = arith.constant 0 : index
    %42 = memref.load %arg1[%c0_12, %c0_13] : memref<1x1xf32, #tpu.memory_space<smem>>
    memref.store %41, %arg1[%c0_12, %c0_13] : memref<1x1xf32, #tpu.memory_space<smem>>
    return
  }
}

</mosaic_0001>

<bundles_post_ra>
// kernel: tpu_custom_call.1
= control target key start
LH: loop header
LB: loop body
LE: loop exit
PB: predicated region body
PF: predicated region fallthrough
CT: control target
= control target key end

     0   :  { %vm13_vm0 = vcmask 80896   ;;  %vm15_vm1 = vcmask 74752   ;;  %s245_s0 = inlined_call_operand.vmem [shape: f32[2,10,10], index: 0, kind: input, shape index: {}]   ;;  %s246_s1 = inlined_call_operand.hbm [shape: f32[1,1], index: 1, kind: output, shape index: {}]  }
   0x1   :  { %v9_v0 = vld [vmem:[%s245_s0] sm:$0xff]  ;;  %v10_v1 = vld [vmem:[%s245_s0 + $0x8] sm:$0x3]  ;;  %v11_v2 = vld [vmem:[%s245_s0 + $0x10] sm:$0xff] }
   0x2   :  { %v12_v3 = vld [vmem:[%s245_s0 + $0x18] sm:$0x3]  ;;  %v14_v4 = vsel %vm13_vm0, %v9_v0, -inf  ;;  %v16_v5 = vsel %vm15_vm1, %v10_v1, -inf  ;;  %v24_v6 = vsel %vm13_vm0, %v11_v2, -inf }
   0x3   :  { %v17_v7 = vmax.f32 %v14_v4, %v16_v5  ;;  %v25_v8 = vsel %vm15_vm1, %v12_v3, -inf }
   0x4   :  { %6 = vsyncpa [#allocation3], 0  ;;  %v26_v9 = vmax.f32 %v24_v6, %v25_v8  ;;  %v67_v38 = vsel %vm13_vm0, %v9_v0, 0.0  ;;  %v76_v40 = vsel %vm13_vm0, %v11_v2, 0.0  ;;  %v68_v41 = vsel %vm15_vm1, %v10_v1, 0.0  ;;  %s176_s21 = scalar_lea.hbm %s246_s1, 16 }
   0x5   :  { %v18_v10 = vrot.slane %v17_v7, 4  ;;  %v77_v42 = vsel %vm15_vm1, %v12_v3, 0.0  ;;  %v69_v47 = vadd.f32 %v68_v41, %v67_v38  ;;  %vm112_vm2 = vcmask 0   ;;  %p177_p0 = scmp.ne.s32.totalorder %s246_s1, %s176_s21  ;;  %p180_p1 = scmp.lt.u32.totalorder %s176_s21, %s246_s1 }
   0x6   :  { %v27_v11 = vrot.slane %v26_v9, 4  ;;  %v78_v48 = vadd.f32 %v77_v42, %v76_v40  ;;  %vm125_vm3 = vcmask 73728  }
   0x7   :  { %v19_v12 = vmax.f32 %v17_v7, %v18_v10  ;;  %v70_v53 = vrot.slane %v69_v47, 4  ;;  %p182_p2 = pnand %p180_p1, %p177_p0 }
   0x8   :  { %v28_v13 = vmax.f32 %v26_v9, %v27_v11  ;;  %v79_v54 = vrot.slane %v78_v48, 4 }
   0x9   :  { %v20_v14 = vrot.slane %v19_v12, 2  ;;  %v71_v59 = vadd.f32 %v70_v53, %v69_v47 }
   0xa   :  { %v29_v15 = vrot.slane %v28_v13, 2  ;;  %v80_v60 = vadd.f32 %v79_v54, %v78_v48 }
   0xb   :  { %v21_v16 = vmax.f32 %v19_v12, %v20_v14  ;;  %v72_v62 = vrot.slane %v71_v59, 2 }
   0xc   :  { %v30_v17 = vmax.f32 %v28_v13, %v29_v15  ;;  %v81_v63 = vrot.slane %v80_v60, 2 }
   0xd   :  { %v22_v18 = vrot.slane %v21_v16, 1 }
   0xe   :  { %v31_v19 = vrot.slane %v30_v17, 1 }
   0xf   :  { %v215_v20 = vmax.f32 %v21_v16, %v22_v18 }
  0x10   :  { %v217_v21 = vmax.f32 %v30_v17, %v31_v19 }
  0x11   :  { %v33_v22 = vsub.f32 %v9_v0, %v215_v20  ;;  %v34_v23 = vsub.f32 %v10_v1, %v215_v20  ;;  %v73_v0 = vadd.f32 %v72_v62, %v71_v59  ;;  %v82_v1 = vadd.f32 %v81_v63, %v80_v60 }
  0x12   :  { %v35_v24 = vsub.f32 %v11_v2, %v217_v21  ;;  %v36_v25 = vsub.f32 %v12_v3, %v217_v21 }
  0x13   :  { %v37_v26 = vmul.f32 1.442695, %v33_v22  ;;  %v39_v27 = vmul.f32 1.442695, %v34_v23  ;;  %v74_v3 = vrot.slane %v73_v0, 1  ;;  %v83_v4 = vrot.slane %v82_v1, 1 }
  0x14   :  { %v41_v28 = vmul.f32 1.442695, %v35_v24  ;;  %v43_v29 = vmul.f32 1.442695, %v36_v25 }
  0x15   :  { %164 = vpow2.f32 %v37_v26  ;;  %v75_v9 = vadd.f32 %v74_v3, %v73_v0  ;;  %v84_v10 = vadd.f32 %v83_v4, %v82_v1 }
  0x16   :  { %166 = vpow2.f32 %v39_v27 }
  0x17   :  { %168 = vpow2.f32 %v41_v28  ;;  %v86_v15 = vmul.f32 0.1, %v75_v9  ;;  %v87_v16 = vmul.f32 0.1, %v84_v10 }
  0x18   :  { %170 = vpow2.f32 %v43_v29 }
  0x1f   :  { %v165_v30 = vpop.eup %164 }
  0x20   :  { %v167_v31 = vpop.eup %166  ;;  %v45_v32 = vsel %vm13_vm0, %v165_v30, 0.0 }
  0x21   :  { %v169_v33 = vpop.eup %168  ;;  %v46_v34 = vsel %vm15_vm1, %v167_v31, 0.0 }
  0x22   :  { %v171_v35 = vpop.eup %170  ;;  %v47_v36 = vadd.f32 %v46_v34, %v45_v32  ;;  %v54_v37 = vsel %vm13_vm0, %v169_v33, 0.0 }
  0x23   :  { %v55_v39 = vsel %vm15_vm1, %v171_v35, 0.0 }
  0x24   :  { %v48_v43 = vrot.slane %v47_v36, 4  ;;  %v56_v44 = vadd.f32 %v55_v39, %v54_v37 }
  0x26   :  { %v49_v45 = vadd.f32 %v48_v43, %v47_v36  ;;  %v57_v46 = vrot.slane %v56_v44, 4 }
  0x28   :  { %v50_v49 = vrot.slane %v49_v45, 2  ;;  %v58_v50 = vadd.f32 %v57_v46, %v56_v44 }
  0x2a   :  { %v51_v51 = vadd.f32 %v50_v49, %v49_v45  ;;  %v59_v52 = vrot.slane %v58_v50, 2 }
  0x2c   :  { %v52_v55 = vrot.slane %v51_v51, 1  ;;  %v60_v56 = vadd.f32 %v59_v52, %v58_v50 }
  0x2e   :  { %v53_v57 = vadd.f32 %v52_v55, %v51_v51  ;;  %v61_v58 = vrot.slane %v60_v56, 1 }
  0x30   :  { %v62_v61 = vadd.f32 %v61_v58, %v60_v56  ;;  %172 = vlog2.f32 %v53_v57 }
  0x32   :  { %174 = vlog2.f32 %v62_v61 }
  0x3a   :  { %v173_v2 = vpop.eup %172 }
  0x3b   :  { %v64_v5 = vmul.f32 0.6931472, %v173_v2 }
  0x3c   :  { %v175_v6 = vpop.eup %174 }
  0x3d   :  { %v66_v7 = vmul.f32 0.6931472, %v175_v6  ;;  %v92_v8 = vsub.f32 %v33_v22, %v64_v5  ;;  %v88_v19 = vadd.f32 %v64_v5, %v215_v20 }
  0x3f   :  { %v93_v11 = vsub.f32 %v35_v24, %v66_v7  ;;  %v94_v12 = vmul.f32 9.0, %v92_v8  ;;  %v89_v23 = vadd.f32 %v66_v7, %v217_v21  ;;  %v90_v22 = vsub.f32 %v88_v19, %v86_v15 }
  0x41   :  { %v95_v13 = vmul.f32 9.0, %v93_v11  ;;  %v98_v14 = vrot.slane %v94_v12, 7  ;;  %v91_v29 = vsub.f32 %v89_v23, %v87_v16  ;;  %v126_v32 = vsel %vm125_vm3, %v90_v22, 0.0 }
  0x43   :  { %v99_v17 = vrot.slane %v95_v13, 7  ;;  %v102_v18 = vadd.f32 %v98_v14, %v92_v8  ;;  %v127_v33 = vsel %vm125_vm3, %v91_v29, 0.0 }
  0x44   :  { %v128_v35 = vadd.f32 %v127_v33, %v126_v32 }
  0x45   :  { %v103_v25 = vadd.f32 %v99_v17, %v93_v11  ;;  %v104_v26 = vsub.f32 0.0, %v102_v18 }
  0x47   :  { %v105_v27 = vsub.f32 0.0, %v103_v25  ;;  %v108_v28 = vrot.slane %v104_v26, 1 }
  0x49   :  { %v109_v24 = vrot.slane %v105_v27, 1  ;;  %v113_v30 = vsel %vm112_vm2, %v108_v28, 0.0 }
  0x4b   :  { %v114_v31 = vsel %vm112_vm2, %v109_v24, 0.0 }
  0x4c   :  { %v115_v34 = vadd.f32 %v114_v31, %v113_v30 }
  0x4e   :  { %116 = vadd.xlane.f32.xlu0 %v115_v34 }
  0x52   :  { %129 = vadd.xlane.f32.xlu0 %v128_v35 }
  0xdb   :  { %v117_v20 = vpop.xlane.xlu0 %116 }
  0xdc   :  { %v118_v36 = vrot.slane %v117_v20, 4 }
  0xde   :  { %v119_v21 = vadd.f32 %v118_v36, %v117_v20 }
  0xdf   :  { %v130_v37 = vpop.xlane.xlu0 %129 }
  0xe0   :  { %v120_v38 = vrot.slane %v119_v21, 2  ;;  %v131_v39 = vrot.slane %v130_v37, 4 }
  0xe2   :  { %v132_v40 = vadd.f32 %v131_v39, %v130_v37  ;;  %v121_v41 = vadd.f32 %v120_v38, %v119_v21 }
  0xe4   :  { %v133_v42 = vrot.slane %v132_v40, 2  ;;  %v122_v43 = vrot.slane %v121_v41, 1 }
  0xe6   :  { %v134_v44 = vadd.f32 %v133_v42, %v132_v40  ;;  %v123_v45 = vadd.f32 %v122_v43, %v121_v41 }
  0xe8   :  { %159 = vpush %v123_v45  ;;  %v135_v46 = vrot.slane %v134_v44, 1 }
  0xea   :  { %v136_v47 = vadd.f32 %v135_v46, %v134_v44 }
  0xec   :  { %161 = vpush %v136_v47 }
 0x119   :  { %s160_s0 = spop %159 }
 0x11a   :  { %s138_s14 = smul.f32 0.9, %s160_s0 }
 0x11d   :  { %s162_s15 = spop %161 }
 0x11e   :  { %s139_s16 = smul.f32 0.1, %s162_s15 }
 0x120   :  { %s140_s17 = sadd.f32 %s139_s16, %s138_s14 }
 0x122   :  { %s143_s18 = smul.f32 0.05, %s140_s17 }
 0x124   :  { %145 = sst [smem:[#allocation2]] %s143_s18 }
 0x125   :  { %185 = shalt.err (!%p182_p2)
}
 0x126   :  { %s188_s26 = smov [#allocation2]  }
 0x127   :  { %153 = dma.smem_to_hbm %s188_s26, 16, %s246_s1, [#allocation3]  }
 0x128   :  { %186 = dma.done.wait [#allocation3], 16  }
 0x129   :  { %187 = vsyncadd [#allocation3], 4294967280 }
 0x12a   :  { %157 = sfence }
 0x12b   :  { %158 = vsyncpa [#allocation3], 1 }

</bundles_post_ra>
